<compile_context>
chip_gen: v6e
topology: v6e:2x2x1
jax: 0.10.0
libtpu: 0.0.40
codegen_flags: <defaults>
</compile_context>

<pallas_src>
import jax
import jax.numpy as jnp
from jax.experimental import pallas as pl
from jax.experimental.pallas import tpu as pltpu

_LANE = 128
_SUBLANE = 8


def _round_up(n, m):
    return ((n + m - 1) // m) * m


def _pad2(a, shape):
    """Zero-pad a 2-D array up to `shape` (top-left aligned)."""
    if a.shape == tuple(shape):
        return a
    return jnp.zeros(shape, a.dtype).at[: a.shape[0], : a.shape[1]].set(a)


def _choose_pack(D, S):
    """Largest power-of-two token-packing factor p with p*D == 128-dense and p | S."""
    if D <= 0 or D > _LANE or _LANE % D != 0:
        return 1
    pack = _LANE // D          # D | 128 => D, pack are powers of two
    while pack > 1 and S % pack != 0:
        pack //= 2
    return pack


def _choose_tiles(B, SP, Dp, itemsize, x_tile_budget_bytes=8 << 20):
    """Pick (TB, TS).

    TB: capped at 256 and at round_up(ceil(B/2), 8) so the 'parallel' batch axis
    has >= 2 grid points whenever B > 8 (both v7x TensorCores get work).
    TS: sized so one x tile (with lane padding) fits the byte budget; TB is
    shrunk first for very wide D so TS never collapses below one sublane.
    """
    TB = min(256, _round_up(max(1, -(-B // 2)), _SUBLANE))
    lane_row_bytes = _round_up(Dp, _LANE) * itemsize
    while TB > _SUBLANE and (x_tile_budget_bytes // (TB * lane_row_bytes)) < _SUBLANE:
        TB = max(_SUBLANE, _round_up(TB // 2, _SUBLANE))
    ts_cap = max(_SUBLANE,
                 (x_tile_budget_bytes // (TB * lane_row_bytes)) // _SUBLANE * _SUBLANE)
    TS = SP if ts_cap >= SP else ts_cap   # block dim == full array dim is always legal
    return TB, TS


def _make_kernel(*, SP, TS, D, Dp, pack, needs_mask):
    """Kernel factory (closes over static tiling/packing constants)."""

    def kernel(x_ref, w1_ref, b1_ref, w2_ref, b2_ref, w3_ref, b3_ref,
               o_ref, pool_ref):
        j = pl.program_id(1)

        # --- init running-max accumulator (pooling_strategy='max', axis=1) ---
        @pl.when(j == 0)
        def _():
            pool_ref[...] = jnp.full_like(pool_ref, -jnp.inf)

        x = x_ref[...]                                       # (TB, TS, Dp), input dtype
        if needs_mask:
            # Token tail of the last tile is out-of-bounds garbage: mask to -inf
            # (neutral for max). Static flag -> no cost when tiling is exact.
            tok = jax.lax.broadcasted_iota(jnp.int32, x.shape, 1)
            neg_inf = jnp.array(-jnp.inf, dtype=x.dtype)
            x = jnp.where((j * TS + tok) < SP, x, neg_inf)
        pool_ref[...] = jnp.maximum(pool_ref[...], jnp.max(x, axis=1))

        # --- feedforward probe, once per batch tile on the last token tile ---
        @pl.when(j == pl.num_programs(1) - 1)
        def _():
            m = pool_ref[...]                                # (TB, Dp)
            if pack > 1:
                # Collapse the `pack` token slots packed along the lane axis with
                # an XLU roll butterfly; lanes [0:D] (and every replicated slot)
                # end up holding the max over all slots.
                shift = Dp // 2
                while shift >= D:
                    m = jnp.maximum(m, pltpu.roll(m, shift, axis=1))
                    shift //= 2
            # W1 rows [D:Dp] are zero, so the replicated lane slots contribute 0.
            h1 = jnp.dot(m.astype(w1_ref.dtype), w1_ref[...],
                         preferred_element_type=jnp.float32) + b1_ref[...]
            h1 = jnp.maximum(h1, 0.0)
            h2 = jnp.dot(h1.astype(w2_ref.dtype), w2_ref[...],
                         preferred_element_type=jnp.float32) + b2_ref[...]
            h2 = jnp.maximum(h2, 0.0)
            out = jnp.dot(h2.astype(w3_ref.dtype), w3_ref[...],
                          preferred_element_type=jnp.float32) + b3_ref[...]
            o_ref[...] = out.astype(o_ref.dtype)

    return kernel


def probing_model_for_sequences(x, params):
    """Pallas forward of ProbingModelForSequences.

    x: (B, S, D).  params: dict with w1,b1,w2,b2,w3,b3; weights are stored
    (in, out) (transposed vs torch) so the kernel does `x @ W` on the MXU.
    """
    B, S, D = x.shape
    w1, b1 = params["w1"], params["b1"]
    w2, b2 = params["w2"], params["b2"]
    w3, b3 = params["w3"], params["b3"]
    H1, H2, O = w1.shape[1], w2.shape[1], w3.shape[1]

    # --- lane-pack D along the minor axis (free row-major view, no copy) ---
    pack = _choose_pack(D, S)
    SP, Dp = S // pack, D * pack
    xp = x.reshape(B, SP, Dp)

    # --- lane-pad the narrow hidden/output dims to 128 (dense MXU / vst) ---
    H1p, H2p, Op = (_round_up(d, _LANE) for d in (H1, H2, O))
    w1p = _pad2(w1, (Dp, H1p))          # extra rows [D:Dp] are zero (packing trick)
    b1p = _pad2(b1, (1, H1p))
    w2p = _pad2(w2, (H1p, H2p))
    b2p = _pad2(b2, (1, H2p))
    w3p = _pad2(w3, (H2p, Op))
    b3p = _pad2(b3, (1, Op))

    # --- tiling (no wrapper-side padding of x; boundary blocks are partial) ---
    itemsize = jnp.dtype(x.dtype).itemsize
    TB, TS = _choose_tiles(B, SP, Dp, itemsize)
    needs_mask = (SP % TS) != 0
    grid = (pl.cdiv(B, TB), pl.cdiv(SP, TS))

    # --- VMEM accounting with (8, 128) lane/sublane padding ---
    lane = lambda n: _round_up(n, _LANE)
    sub = lambda n: _round_up(n, _SUBLANE)
    weight_vmem = sum(sub(a.shape[0]) * lane(a.shape[1]) * a.dtype.itemsize
                      for a in (w1p, b1p, w2p, b2p, w3p, b3p))
    x_tile_vmem = TB * sub(TS) * lane(Dp) * itemsize
    out_tile_vmem = TB * lane(Op) * 4
    pool_vmem = TB * lane(Dp) * itemsize
    total_vmem = 2 * x_tile_vmem + 2 * out_tile_vmem + 2 * weight_vmem + pool_vmem
    vmem_limit = int(min(max(total_vmem + (4 << 20), 16 << 20), 48 << 20))

    # --- advisory cost estimate from the true (unpadded) dims ---
    flops = 2 * B * (D * H1 + H1 * H2 + H2 * O)
    weight_bytes = sum(int(a.size) * a.dtype.itemsize
                       for a in (w1p, b1p, w2p, b2p, w3p, b3p))
    bytes_accessed = int(x.size) * itemsize + weight_bytes + B * Op * 4

    kernel = _make_kernel(SP=SP, TS=TS, D=D, Dp=Dp, pack=pack,
                          needs_mask=needs_mask)
    resident = lambda i, j: (0, 0)
    out = pl.pallas_call(
        kernel,
        out_shape=jax.ShapeDtypeStruct((B, Op), jnp.float32),
        grid_spec=pltpu.PrefetchScalarGridSpec(
            num_scalar_prefetch=0,
            grid=grid,
            in_specs=[
                pl.BlockSpec((TB, TS, Dp), lambda i, j: (i, j, 0)),
                pl.BlockSpec((Dp, H1p), resident),
                pl.BlockSpec((1, H1p), resident),
                pl.BlockSpec((H1p, H2p), resident),
                pl.BlockSpec((1, H2p), resident),
                pl.BlockSpec((H2p, Op), resident),
                pl.BlockSpec((1, Op), resident),
            ],
            out_specs=pl.BlockSpec((TB, Op), lambda i, j: (i, 0)),
            scratch_shapes=[pltpu.VMEM((TB, Dp), x.dtype)],
        ),
        compiler_params=pltpu.CompilerParams(
            dimension_semantics=("parallel", "arbitrary"),
            vmem_limit_bytes=vmem_limit,
        ),
        cost_estimate=pl.CostEstimate(
            flops=flops, transcendentals=0, bytes_accessed=bytes_accessed),
    )(xp, w1p, b1p, w2p, b2p, w3p, b3p)

    out = out[:, :O]
    # torch's out.squeeze(-1): only drops the last dim if it is size 1.
    if O == 1:
        out = out[:, 0]
    return out


def _init_params(key, input_dim, hidden_dims, output_dim, param_dtype=jnp.float32):
    """Deterministic init mimicking torch.nn.Linear (U[-1/sqrt(fan_in), +1/sqrt(fan_in)]).

    Weights are stored transposed relative to torch ((in, out)). On v6e/v7x,
    param_dtype=jnp.bfloat16 halves weight VMEM/DMA traffic (f32 accumulate).
    """
    dims = [input_dim] + list(hidden_dims) + [output_dim]
    params = {}
    for i in range(len(dims) - 1):
        fan_in, fan_out = dims[i], dims[i + 1]
        key, kw, kb = jax.random.split(key, 3)
        bound = 1.0 / jnp.sqrt(jnp.float32(fan_in))
        w = jax.random.uniform(kw, (fan_in, fan_out), jnp.float32, -bound, bound)
        b = jax.random.uniform(kb, (1, fan_out), jnp.float32, -bound, bound)
        params[f"w{i + 1}"] = w.astype(param_dtype)
        params[f"b{i + 1}"] = b                      # biases kept in f32
    return params


def _reference(x, params):
    pooled = jnp.max(x.astype(jnp.float32), axis=1)
    h1 = jnp.maximum(pooled @ params["w1"].astype(jnp.float32) + params["b1"], 0.0)
    h2 = jnp.maximum(h1 @ params["w2"].astype(jnp.float32) + params["b2"], 0.0)
    return h2 @ params["w3"].astype(jnp.float32) + params["b3"]


if __name__ == "__main__":
    # Module configuration: input_dim=32, hidden_layer_dims=(32, 16),
    # output_dim=3, pooling_strategy='max', pooling_axis=1,
    # include_batch_norm=False, dropout=0.0 (eval-mode no-op).
    B, S, D = 4, 8, 32
    HIDDEN = (32, 16)
    OUT = 3

    key = jax.random.PRNGKey(0)
    key, kx = jax.random.split(key)
    x = jax.random.normal(kx, (B, S, D), jnp.float32)

    params = _init_params(key, D, HIDDEN, OUT)

    fwd = jax.jit(probing_model_for_sequences)
    y = jax.block_until_ready(fwd(x, params))

    y_ref = _reference(x, params)
    assert y.shape == (B, OUT), y.shape
    assert jnp.allclose(y, y_ref, atol=1e-5, rtol=1e-5), "mismatch vs reference"

    print("KERNEL_OK")
</pallas_src>

<mosaic_0001>
module attributes {stable_mosaic.version = 11 : i64} {
  func.func @kernel(%arg0: i32, %arg1: i32, %arg2: memref<8x2x128xf32, #tpu.memory_space<vmem>>, %arg3: memref<128x128xf32, #tpu.memory_space<vmem>>, %arg4: memref<1x128xf32, #tpu.memory_space<vmem>>, %arg5: memref<128x128xf32, #tpu.memory_space<vmem>>, %arg6: memref<1x128xf32, #tpu.memory_space<vmem>>, %arg7: memref<128x128xf32, #tpu.memory_space<vmem>>, %arg8: memref<1x128xf32, #tpu.memory_space<vmem>>, %arg9: memref<8x128xf32, #tpu.memory_space<vmem>>, %arg10: memref<8x128xf32, #tpu.memory_space<vmem>>) attributes {dimension_semantics = [#tpu.dimension_semantics<parallel>, #tpu.dimension_semantics<arbitrary>], iteration_bounds = array<i64: 1, 1>, scalar_prefetch = 0 : i64, scratch_operands = 1 : i64, tpu.core_type = #tpu.core_type<tc>, window_params = [{transform_indices = @transform_0, window_bounds = array<i64: 8, 2, 128>}, {pipeline_mode = #tpu.pipeline_mode<synchronous>, transform_indices = @transform_1, window_bounds = array<i64: 128, 128>}, {pipeline_mode = #tpu.pipeline_mode<synchronous>, transform_indices = @transform_2, window_bounds = array<i64: 1, 128>}, {pipeline_mode = #tpu.pipeline_mode<synchronous>, transform_indices = @transform_3, window_bounds = array<i64: 128, 128>}, {pipeline_mode = #tpu.pipeline_mode<synchronous>, transform_indices = @transform_4, window_bounds = array<i64: 1, 128>}, {pipeline_mode = #tpu.pipeline_mode<synchronous>, transform_indices = @transform_5, window_bounds = array<i64: 128, 128>}, {pipeline_mode = #tpu.pipeline_mode<synchronous>, transform_indices = @transform_6, window_bounds = array<i64: 1, 128>}, {transform_indices = @transform_7, window_bounds = array<i64: 8, 128>}]} {
    %c0_i32 = arith.constant 0 : i32
    %0 = arith.cmpi eq, %arg1, %c0_i32 : i32
    %1 = arith.extui %0 : i1 to i32
    %c0_i32_0 = arith.constant 0 : i32
    %2 = arith.cmpi ne, %1, %c0_i32_0 : i32
    scf.if %2 {
      %cst_9 = arith.constant 0xFF800000 : f32
      %11 = vector.broadcast %cst_9 : f32 to vector<8x128xf32>
      %c0_10 = arith.constant 0 : index
      %c0_11 = arith.constant 0 : index
      %12 = vector.load %arg10[%c0_10, %c0_11] : memref<8x128xf32, #tpu.memory_space<vmem>>, vector<8x128xf32>
      tpu.vector_store %arg10[%c0_10, %c0_11], %11 {strides = array<i32>} : memref<8x128xf32, #tpu.memory_space<vmem>>, vector<8x128xf32>,
    } else {
    }
    %c0 = arith.constant 0 : index
    %c0_1 = arith.constant 0 : index
    %c0_2 = arith.constant 0 : index
    %3 = vector.load %arg2[%c0, %c0_1, %c0_2] : memref<8x2x128xf32, #tpu.memory_space<vmem>>, vector<8x2x128xf32>
    %c0_3 = arith.constant 0 : index
    %c0_4 = arith.constant 0 : index
    %4 = vector.load %arg10[%c0_3, %c0_4] : memref<8x128xf32, #tpu.memory_space<vmem>>, vector<8x128xf32>
    %cst = arith.constant dense<0xFF800000> : vector<8x128xf32>
    %5 = vector.multi_reduction <maximumf>, %3, %cst [1] : vector<8x2x128xf32> to vector<8x128xf32>
    %6 = arith.maximumf %4, %5 : vector<8x128xf32>
    %c0_5 = arith.constant 0 : index
    %c0_6 = arith.constant 0 : index
    %7 = vector.load %arg10[%c0_5, %c0_6] : memref<8x128xf32, #tpu.memory_space<vmem>>, vector<8x128xf32>
    tpu.vector_store %arg10[%c0_5, %c0_6], %6 {strides = array<i32>} : memref<8x128xf32, #tpu.memory_space<vmem>>, vector<8x128xf32>,
    %c0_i32_7 = arith.constant 0 : i32
    %8 = arith.cmpi eq, %arg1, %c0_i32_7 : i32
    %9 = arith.extui %8 : i1 to i32
    %c0_i32_8 = arith.constant 0 : i32
    %10 = arith.cmpi ne, %9, %c0_i32_8 : i32
    scf.if %10 {
      %c0_9 = arith.constant 0 : index
      %c0_10 = arith.constant 0 : index
      %11 = vector.load %arg10[%c0_9, %c0_10] : memref<8x128xf32, #tpu.memory_space<vmem>>, vector<8x128xf32>
      %c64_i32 = arith.constant 64 : i32
      %12 = tpu.dynamic_rotate %11 by %c64_i32 dim 1 : vector<8x128xf32>, i32 -> vector<8x128xf32>
      %13 = arith.maximumf %11, %12 : vector<8x128xf32>
      %c32_i32 = arith.constant 32 : i32
      %14 = tpu.dynamic_rotate %13 by %c32_i32 dim 1 : vector<8x128xf32>, i32 -> vector<8x128xf32>
      %15 = arith.maximumf %13, %14 : vector<8x128xf32>
      %c0_11 = arith.constant 0 : index
      %c0_12 = arith.constant 0 : index
      %16 = vector.load %arg3[%c0_11, %c0_12] : memref<128x128xf32, #tpu.memory_space<vmem>>, vector<128x128xf32>
      %cst_13 = arith.constant dense<0.000000e+00> : vector<8x128xf32>
      %17 = tpu.matmul %15, %16, %cst_13 {dimension_numbers = #tpu.dot_dimension_numbers<[1], [0], [0], [1], [0, 0, 1, 1], [], []>} : vector<8x128xf32>, vector<128x128xf32>, vector<8x128xf32> -> vector<8x128xf32>
      %c0_14 = arith.constant 0 : index
      %c0_15 = arith.constant 0 : index
      %18 = vector.load %arg4[%c0_14, %c0_15] : memref<1x128xf32, #tpu.memory_space<vmem>>, vector<1x128xf32>
      %19 = vector.broadcast %18 : vector<1x128xf32> to vector<8x128xf32>
      %20 = arith.addf %17, %19 : vector<8x128xf32>
      %cst_16 = arith.constant 0.000000e+00 : f32
      %21 = vector.broadcast %cst_16 : f32 to vector<8x128xf32>
      %22 = arith.maximumf %20, %21 : vector<8x128xf32>
      %c0_17 = arith.constant 0 : index
      %c0_18 = arith.constant 0 : index
      %23 = vector.load %arg5[%c0_17, %c0_18] : memref<128x128xf32, #tpu.memory_space<vmem>>, vector<128x128xf32>
      %cst_19 = arith.constant dense<0.000000e+00> : vector<8x128xf32>
      %24 = tpu.matmul %22, %23, %cst_19 {dimension_numbers = #tpu.dot_dimension_numbers<[1], [0], [0], [1], [0, 0, 1, 1], [], []>} : vector<8x128xf32>, vector<128x128xf32>, vector<8x128xf32> -> vector<8x128xf32>
      %c0_20 = arith.constant 0 : index
      %c0_21 = arith.constant 0 : index
      %25 = vector.load %arg6[%c0_20, %c0_21] : memref<1x128xf32, #tpu.memory_space<vmem>>, vector<1x128xf32>
      %26 = vector.broadcast %25 : vector<1x128xf32> to vector<8x128xf32>
      %27 = arith.addf %24, %26 : vector<8x128xf32>
      %cst_22 = arith.constant 0.000000e+00 : f32
      %28 = vector.broadcast %cst_22 : f32 to vector<8x128xf32>
      %29 = arith.maximumf %27, %28 : vector<8x128xf32>
      %c0_23 = arith.constant 0 : index
      %c0_24 = arith.constant 0 : index
      %30 = vector.load %arg7[%c0_23, %c0_24] : memref<128x128xf32, #tpu.memory_space<vmem>>, vector<128x128xf32>
      %cst_25 = arith.constant dense<0.000000e+00> : vector<8x128xf32>
      %31 = tpu.matmul %29, %30, %cst_25 {dimension_numbers = #tpu.dot_dimension_numbers<[1], [0], [0], [1], [0, 0, 1, 1], [], []>} : vector<8x128xf32>, vector<128x128xf32>, vector<8x128xf32> -> vector<8x128xf32>
      %c0_26 = arith.constant 0 : index
      %c0_27 = arith.constant 0 : index
      %32 = vector.load %arg8[%c0_26, %c0_27] : memref<1x128xf32, #tpu.memory_space<vmem>>, vector<1x128xf32>
      %33 = vector.broadcast %32 : vector<1x128xf32> to vector<8x128xf32>
      %34 = arith.addf %31, %33 : vector<8x128xf32>
      %c0_28 = arith.constant 0 : index
      %c0_29 = arith.constant 0 : index
      %35 = vector.load %arg9[%c0_28, %c0_29] : memref<8x128xf32, #tpu.memory_space<vmem>>, vector<8x128xf32>
      tpu.vector_store %arg9[%c0_28, %c0_29], %34 {strides = array<i32>} : memref<8x128xf32, #tpu.memory_space<vmem>>, vector<8x128xf32>,
    } else {
    }
    return
  }
  func.func @transform_0(%arg0: i32, %arg1: i32) -> (i32, i32, i32) {
    %c0_i32 = arith.constant 0 : i32
    %c0_i32_0 = arith.constant 0 : i32
    return %arg0, %arg1, %c0_i32 : i32, i32, i32
  }
  func.func @transform_1(%arg0: i32, %arg1: i32) -> (i32, i32) {
    %c0_i32 = arith.constant 0 : i32
    %c0_i32_0 = arith.constant 0 : i32
    %c0_i32_1 = arith.constant 0 : i32
    return %c0_i32, %c0_i32_0 : i32, i32
  }
  func.func @transform_2(%arg0: i32, %arg1: i32) -> (i32, i32) {
    %c0_i32 = arith.constant 0 : i32
    %c0_i32_0 = arith.constant 0 : i32
    %c0_i32_1 = arith.constant 0 : i32
    return %c0_i32, %c0_i32_0 : i32, i32
  }
  func.func @transform_3(%arg0: i32, %arg1: i32) -> (i32, i32) {
    %c0_i32 = arith.constant 0 : i32
    %c0_i32_0 = arith.constant 0 : i32
    %c0_i32_1 = arith.constant 0 : i32
    return %c0_i32, %c0_i32_0 : i32, i32
  }
  func.func @transform_4(%arg0: i32, %arg1: i32) -> (i32, i32) {
    %c0_i32 = arith.constant 0 : i32
    %c0_i32_0 = arith.constant 0 : i32
    %c0_i32_1 = arith.constant 0 : i32
    return %c0_i32, %c0_i32_0 : i32, i32
  }
  func.func @transform_5(%arg0: i32, %arg1: i32) -> (i32, i32) {
    %c0_i32 = arith.constant 0 : i32
    %c0_i32_0 = arith.constant 0 : i32
    %c0_i32_1 = arith.constant 0 : i32
    return %c0_i32, %c0_i32_0 : i32, i32
  }
  func.func @transform_6(%arg0: i32, %arg1: i32) -> (i32, i32) {
    %c0_i32 = arith.constant 0 : i32
    %c0_i32_0 = arith.constant 0 : i32
    %c0_i32_1 = arith.constant 0 : i32
    return %c0_i32, %c0_i32_0 : i32, i32
  }
  func.func @transform_7(%arg0: i32, %arg1: i32) -> (i32, i32) {
    %c0_i32 = arith.constant 0 : i32
    %c0_i32_0 = arith.constant 0 : i32
    return %arg0, %c0_i32 : i32, i32
  }
}

</mosaic_0001>

<bundles_post_ra>
// kernel: probing_model_for_sequences.1
= control target key start
LH: loop header
LB: loop body
LE: loop exit
PB: predicated region body
PF: predicated region fallthrough
CT: control target
= control target key end

     0   :  { %vm41_vm0 = vcmask 1041408   ;;  %s906_s0 = inlined_call_operand.vmem [shape: f32[4,2,128], index: 0, kind: input, shape index: {}]   ;;  %s907_s1 = inlined_call_operand.vmem [shape: f32[128,128], index: 1, kind: input, shape index: {}]   ;;  %s908_s2 = inlined_call_operand.vmem [shape: f32[1,128], index: 2, kind: input, shape index: {}]   ;;  %s909_s3 = inlined_call_operand.vmem [shape: f32[128,128], index: 3, kind: input, shape index: {}]   ;;  %s910_s4 = inlined_call_operand.vmem [shape: f32[1,128], index: 4, kind: input, shape index: {}]   ;;  %s911_s5 = inlined_call_operand.vmem [shape: f32[128,128], index: 5, kind: input, shape index: {}]   ;;  %s912_s6 = inlined_call_operand.vmem [shape: f32[1,128], index: 6, kind: input, shape index: {}]   ;;  %s913_s7 = inlined_call_operand.hbm [shape: f32[4,128], index: 7, kind: output, shape index: {}]  }
   0x1   :  { %v32_v0 = vld [vmem:[%s906_s0] sm:$0x3]  ;;  %v33_v1 = vld [vmem:[%s906_s0 + $0x2] sm:$0x3]  ;;  %v34_v2 = vld [vmem:[%s906_s0 + $0x4] sm:$0x3] }
   0x2   :  { %v35_v3 = vld [vmem:[%s906_s0 + $0x6] sm:$0x3]  ;;  %v36_v4 = vld [vmem:[%s906_s0 + $0x8] sm:$0x3]  ;;  %v37_v5 = vld [vmem:[%s906_s0 + $0xa] sm:$0x3] }
   0x3   :  { %v38_v6 = vld [vmem:[%s906_s0 + $0xc] sm:$0x3]  ;;  %v39_v7 = vld [vmem:[%s906_s0 + $0xe] sm:$0x3]  ;;  %v42_v8 = vsel %vm41_vm0, %v32_v0, -inf  ;;  %v49_v9 = vsel %vm41_vm0, %v33_v1, -inf }
   0x4   :  { %v56_v10 = vsel %vm41_vm0, %v34_v2, -inf  ;;  %v63_v11 = vsel %vm41_vm0, %v35_v3, -inf  ;;  %v43_v12 = vrot.slane %v42_v8, 4  ;;  %v50_v13 = vrot.slane %v49_v9, 4 }
   0x5   :  { %v57_v14 = vrot.slane %v56_v10, 4  ;;  %v64_v15 = vrot.slane %v63_v11, 4 }
   0x6   :  { %12 = vsyncpa [#allocation4], 0  ;;  %v70_v16 = vsel %vm41_vm0, %v36_v4, -inf  ;;  %v77_v17 = vsel %vm41_vm0, %v37_v5, -inf  ;;  %v84_v18 = vsel %vm41_vm0, %v38_v6, -inf  ;;  %v91_v19 = vsel %vm41_vm0, %v39_v7, -inf }
   0x7   :  { %vm106_vm1 = vcmask 1041409   ;;  %v44_v20 = vmax.f32 %v42_v8, %v43_v12  ;;  %v51_v21 = vmax.f32 %v49_v9, %v50_v13  ;;  %v58_v22 = vmax.f32 %v56_v10, %v57_v14  ;;  %v148_v1 = vld [vmem:[%s907_s1 + $0x78] sm:$0xff]  ;;  %v147_v6 = vld [vmem:[%s907_s1 + $0x70] sm:$0xff]  ;;  %v146_v9 = vld [vmem:[%s907_s1 + $0x68] sm:$0xff]  ;;  %s619_s22 = smov 64   ;;  %s621_s16 = smov 32  }
   0x8   :  { %v65_v23 = vmax.f32 %v63_v11, %v64_v15  ;;  %v71_v24 = vrot.slane %v70_v16, 4  ;;  %v78_v25 = vrot.slane %v77_v17, 4  ;;  %v85_v26 = vrot.slane %v84_v18, 4  ;;  %v145_v11 = vld [vmem:[%s907_s1 + $0x60] sm:$0xff]  ;;  %v144_v12 = vld [vmem:[%s907_s1 + $0x58] sm:$0xff]  ;;  %v143_v13 = vld [vmem:[%s907_s1 + $0x50] sm:$0xff] }
   0x9   :  { %v92_v27 = vrot.slane %v91_v19, 4  ;;  %v45_v28 = vrot.slane %v44_v20, 2  ;;  %v52_v29 = vrot.slane %v51_v21, 2  ;;  %v59_v30 = vrot.slane %v58_v22, 2  ;;  %v142_v14 = vld [vmem:[%s907_s1 + $0x48] sm:$0xff]  ;;  %v141_v15 = vld [vmem:[%s907_s1 + $0x40] sm:$0xff] }
   0xa   :  { %v66_v31 = vrot.slane %v65_v23, 2  ;;  %v72_v32 = vmax.f32 %v70_v16, %v71_v24  ;;  %v79_v33 = vmax.f32 %v77_v17, %v78_v25  ;;  %v86_v34 = vmax.f32 %v84_v18, %v85_v26  ;;  %v140_v16 = vld [vmem:[%s907_s1 + $0x38] sm:$0xff]  ;;  %v139_v17 = vld [vmem:[%s907_s1 + $0x30] sm:$0xff]  ;;  %v138_v18 = vld [vmem:[%s907_s1 + $0x28] sm:$0xff] }
   0xb   :  { %v93_v35 = vmax.f32 %v91_v19, %v92_v27  ;;  %v46_v36 = vmax.f32 %v44_v20, %v45_v28  ;;  %v53_v37 = vmax.f32 %v51_v21, %v52_v29  ;;  %v60_v38 = vmax.f32 %v58_v22, %v59_v30  ;;  %v137_v19 = vld [vmem:[%s907_s1 + $0x20] sm:$0xff]  ;;  %v136_v20 = vld [vmem:[%s907_s1 + $0x18] sm:$0xff]  ;;  %v135_v21 = vld [vmem:[%s907_s1 + $0x10] sm:$0xff] }
   0xc   :  { %v67_v39 = vmax.f32 %v65_v23, %v66_v31  ;;  %v73_v40 = vrot.slane %v72_v32, 2  ;;  %v80_v41 = vrot.slane %v79_v33, 2  ;;  %v87_v42 = vrot.slane %v86_v34, 2  ;;  %v134_v22 = vld [vmem:[%s907_s1 + $0x8] sm:$0xff]  ;;  %v133_v23 = vld [vmem:[%s907_s1] sm:$0xff]  ;;  %v242_v24 = vld [vmem:[%s909_s3 + $0x78] sm:$0xff] }
   0xd   :  { %v94_v43 = vrot.slane %v93_v35, 2  ;;  %v47_v44 = vrot.slane %v46_v36, 1  ;;  %v54_v45 = vrot.slane %v53_v37, 1  ;;  %v61_v46 = vrot.slane %v60_v38, 1  ;;  %v241_v25 = vld [vmem:[%s909_s3 + $0x70] sm:$0xff]  ;;  %v240_v26 = vld [vmem:[%s909_s3 + $0x68] sm:$0xff] }
   0xe   :  { %v68_v47 = vrot.slane %v67_v39, 1  ;;  %v74_v48 = vmax.f32 %v72_v32, %v73_v40  ;;  %v81_v49 = vmax.f32 %v79_v33, %v80_v41  ;;  %v88_v50 = vmax.f32 %v86_v34, %v87_v42  ;;  %v239_v27 = vld [vmem:[%s909_s3 + $0x60] sm:$0xff]  ;;  %v238_v28 = vld [vmem:[%s909_s3 + $0x58] sm:$0xff]  ;;  %v237_v30 = vld [vmem:[%s909_s3 + $0x50] sm:$0xff] }
   0xf   :  { %v95_v51 = vmax.f32 %v93_v35, %v94_v43  ;;  %v48_v52 = vmax.f32 %v46_v36, %v47_v44  ;;  %v55_v53 = vmax.f32 %v53_v37, %v54_v45  ;;  %v62_v54 = vmax.f32 %v60_v38, %v61_v46  ;;  %v236_v32 = vld [vmem:[%s909_s3 + $0x48] sm:$0xff]  ;;  %v235_v33 = vld [vmem:[%s909_s3 + $0x40] sm:$0xff]  ;;  %v234_v34 = vld [vmem:[%s909_s3 + $0x38] sm:$0xff] }
  0x10   :  { %v69_v55 = vmax.f32 %v67_v39, %v68_v47  ;;  %v75_v56 = vrot.slane %v74_v48, 1  ;;  %v82_v57 = vrot.slane %v81_v49, 1  ;;  %v89_v58 = vrot.slane %v88_v50, 1  ;;  %v233_v35 = vld [vmem:[%s909_s3 + $0x30] sm:$0xff]  ;;  %v232_v36 = vld [vmem:[%s909_s3 + $0x28] sm:$0xff]  ;;  %v231_v37 = vld [vmem:[%s909_s3 + $0x20] sm:$0xff] }
  0x11   :  { %v96_v59 = vrot.slane %v95_v51, 1  ;;  %v107_v60 = vsel %vm106_vm1, %v55_v53, %v48_v52  ;;  %vm108_vm2 = vcmask 1042434   ;;  %vm110_vm3 = vcmask 1043459   ;;  %v230_v38 = vld [vmem:[%s909_s3 + $0x18] sm:$0xff]  ;;  %v229_v41 = vld [vmem:[%s909_s3 + $0x10] sm:$0xff]  ;;  %v228_v42 = vld [vmem:[%s909_s3 + $0x8] sm:$0xff] }
  0x12   :  { %v76_v61 = vmax.f32 %v74_v48, %v75_v56  ;;  %v83_v62 = vmax.f32 %v81_v49, %v82_v57  ;;  %vm112_vm4 = vcmask 1044484   ;;  %v90_v63 = vmax.f32 %v88_v50, %v89_v58  ;;  %v227_v43 = vld [vmem:[%s909_s3] sm:$0xff]  ;;  %v336_v44 = vld [vmem:[%s911_s5 + $0x78] sm:$0xff]  ;;  %v335_v45 = vld [vmem:[%s911_s5 + $0x70] sm:$0xff] }
  0x13   :  { %v109_v0 = vsel %vm108_vm2, %v62_v54, %v107_v60  ;;  %vm114_vm5 = vcmask 1045509   ;;  %v97_v2 = vmax.f32 %v95_v51, %v96_v59  ;;  %vm116_vm6 = vcmask 1046534   ;;  %v334_v46 = vld [vmem:[%s911_s5 + $0x68] sm:$0xff]  ;;  %v333_v47 = vld [vmem:[%s911_s5 + $0x60] sm:$0xff]  ;;  %v332_v48 = vld [vmem:[%s911_s5 + $0x58] sm:$0xff] }
  0x14   :  { %v111_v3 = vsel %vm110_vm3, %v69_v55, %v109_v0  ;;  %vm118_vm7 = vcmask 1047559   ;;  %v618_v5 = vmov 0.0   ;;  %vm620_vm8 = vmmov 0   ;;  %v331_v49 = vld [vmem:[%s911_s5 + $0x50] sm:$0xff]  ;;  %v330_v50 = vld [vmem:[%s911_s5 + $0x48] sm:$0xff]  ;;  %v329_v51 = vld [vmem:[%s911_s5 + $0x40] sm:$0xff] }
  0x15   :  { %v113_v4 = vsel %vm112_vm4, %v76_v61, %v111_v3  ;;  %485 = vmatprep.subr.mxu0 %v618_v5  ;;  %520 = vmatprep.subr.mxu1 %v618_v5  ;;  %v328_v52 = vld [vmem:[%s911_s5 + $0x38] sm:$0xff]  ;;  %v327_v53 = vld [vmem:[%s911_s5 + $0x30] sm:$0xff]  ;;  %v326_v54 = vld [vmem:[%s911_s5 + $0x28] sm:$0xff] }
  0x16   :  { %v115_v7 = vsel %vm114_vm5, %v83_v62, %v113_v4  ;;  %486 = vmatpush3.msra.mxu0 %v148_v1  ;;  %517 = vmatprep.mubr.msk.f32.mxu0 %vm620_vm8, %v618_v5  ;;  %v325_v55 = vld [vmem:[%s911_s5 + $0x20] sm:$0xff]  ;;  %v324_v56 = vld [vmem:[%s911_s5 + $0x18] sm:$0xff]  ;;  %v323_v62 = vld [vmem:[%s911_s5 + $0x10] sm:$0xff] }
  0x17   :  { %v117_v8 = vsel %vm116_vm6, %v90_v63, %v115_v7  ;;  %487 = vmatprep.subr.mxu0 %v618_v5  ;;  %552 = vmatprep.mubr.msk.f32.mxu1 %vm620_vm8, %v618_v5  ;;  %v431_v57 = vld [vmem:[%s908_s2] ss:$0 sm:$0xff]  ;;  %v322_v63 = vld [vmem:[%s911_s5 + $0x8] sm:$0xff] }
  0x18   :  { %v701_v10 = vsel %vm118_vm7, %v97_v2, %v117_v8  ;;  %488 = vmatpush3.msra.mxu0 %v147_v6  ;;  %521 = vmatpush3.msra.mxu1 %v242_v24  ;;  %v321_v0 = vld [vmem:[%s911_s5] sm:$0xff] }
  0x19   :  { %127 = vrot.lane.b32.xlu0 %v701_v10, %s619_s22  ;;  %489 = vmatprep.subr.mxu0 %v618_v5  ;;  %v432_v1 = vld [vmem:[%s910_s4] ss:$0 sm:$0xff] }
  0x1a   :  { %490 = vmatpush3.msra.mxu0 %v146_v9  ;;  %522 = vmatprep.subr.mxu1 %v618_v5  ;;  %v433_v7 = vld [vmem:[%s912_s6] ss:$0 sm:$0xff] }
  0x1b   :  { %491 = vmatprep.subr.mxu0 %v618_v5  ;;  %523 = vmatpush3.msra.mxu1 %v241_v25 }
  0x1c   :  { %492 = vmatpush3.msra.mxu0 %v145_v11  ;;  %524 = vmatprep.subr.mxu1 %v618_v5 }
  0x1d   :  { %493 = vmatprep.subr.mxu0 %v618_v5  ;;  %525 = vmatpush3.msra.mxu1 %v240_v26 }
  0x1e   :  { %494 = vmatpush3.msra.mxu0 %v144_v12  ;;  %526 = vmatprep.subr.mxu1 %v618_v5 }
  0x1f   :  { %495 = vmatprep.subr.mxu0 %v618_v5  ;;  %527 = vmatpush3.msra.mxu1 %v239_v27 }
  0x20   :  { %496 = vmatpush3.msra.mxu0 %v143_v13  ;;  %528 = vmatprep.subr.mxu1 %v618_v5 }
  0x21   :  { %497 = vmatprep.subr.mxu0 %v618_v5  ;;  %529 = vmatpush3.msra.mxu1 %v238_v28 }
  0x22   :  { %498 = vmatpush3.msra.mxu0 %v142_v14  ;;  %530 = vmatprep.subr.mxu1 %v618_v5 }
  0x23   :  { %499 = vmatprep.subr.mxu0 %v618_v5  ;;  %531 = vmatpush3.msra.mxu1 %v237_v30 }
  0x24   :  { %500 = vmatpush3.msra.mxu0 %v141_v15  ;;  %532 = vmatprep.subr.mxu1 %v618_v5 }
  0x25   :  { %501 = vmatprep.subr.mxu0 %v618_v5  ;;  %533 = vmatpush3.msra.mxu1 %v236_v32 }
  0x26   :  { %502 = vmatpush3.msra.mxu0 %v140_v16  ;;  %534 = vmatprep.subr.mxu1 %v618_v5 }
  0x27   :  { %503 = vmatprep.subr.mxu0 %v618_v5  ;;  %535 = vmatpush3.msra.mxu1 %v235_v33 }
  0x28   :  { %504 = vmatpush3.msra.mxu0 %v139_v17  ;;  %536 = vmatprep.subr.mxu1 %v618_v5 }
  0x29   :  { %505 = vmatprep.subr.mxu0 %v618_v5  ;;  %537 = vmatpush3.msra.mxu1 %v234_v34 }
  0x2a   :  { %506 = vmatpush3.msra.mxu0 %v138_v18  ;;  %538 = vmatprep.subr.mxu1 %v618_v5 }
  0x2b   :  { %507 = vmatprep.subr.mxu0 %v618_v5  ;;  %539 = vmatpush3.msra.mxu1 %v233_v35 }
  0x2c   :  { %508 = vmatpush3.msra.mxu0 %v137_v19  ;;  %540 = vmatprep.subr.mxu1 %v618_v5 }
  0x2d   :  { %509 = vmatprep.subr.mxu0 %v618_v5  ;;  %541 = vmatpush3.msra.mxu1 %v232_v36 }
  0x2e   :  { %510 = vmatpush3.msra.mxu0 %v136_v20  ;;  %542 = vmatprep.subr.mxu1 %v618_v5 }
  0x2f   :  { %511 = vmatprep.subr.mxu0 %v618_v5  ;;  %543 = vmatpush3.msra.mxu1 %v231_v37 }
  0x30   :  { %512 = vmatpush3.msra.mxu0 %v135_v21  ;;  %544 = vmatprep.subr.mxu1 %v618_v5 }
  0x31   :  { %513 = vmatprep.subr.mxu0 %v618_v5  ;;  %545 = vmatpush3.msra.mxu1 %v230_v38 }
  0x32   :  { %514 = vmatpush3.msra.mxu0 %v134_v22  ;;  %546 = vmatprep.subr.mxu1 %v618_v5 }
  0x33   :  { %515 = vmatprep.subr.mxu0 %v618_v5  ;;  %547 = vmatpush3.msra.mxu1 %v229_v41 }
  0x34   :  { %516 = vmatpush3.msra.mxu0 %v133_v23  ;;  %548 = vmatprep.subr.mxu1 %v618_v5 }
  0x35   :  { %555 = vmatprep.subr.mxu0 %v618_v5  ;;  %549 = vmatpush3.msra.mxu1 %v228_v42 }
  0x36   :  { %550 = vmatprep.subr.mxu1 %v618_v5 }
  0x37   :  { %551 = vmatpush3.msra.mxu1 %v227_v43 }
  0x8b   :  { %v128_v29 = vpop.permute.xlu0 %127 }
  0x8c   :  { %v129_v31 = vmax.f32 %v701_v10, %v128_v29 }
  0x8e   :  { %130 = vrot.lane.b32.xlu0 %v129_v31, %s621_s16 }
 0x100   :  { %v131_v39 = vpop.permute.xlu0 %130 }
 0x101   :  { %v132_v40 = vmax.f32 %v129_v31, %v131_v39 }
 0x103   :  { %518 = vmatmul.mubr.f32.vlgmr.msra.gmra.mxu0 %v132_v40 }
 0x104   :  { %587 = vmatprep.mubr.msk.f32.mxu0 %vm620_vm8, %v618_v5  ;;  %556 = vmatpush3.msra.mxu0 %v336_v44 }
 0x105   :  { %557 = vmatprep.subr.mxu0 %v618_v5 }
 0x106   :  { %558 = vmatpush3.msra.mxu0 %v335_v45 }
 0x107   :  { %559 = vmatprep.subr.mxu0 %v618_v5 }
 0x108   :  { %560 = vmatpush3.msra.mxu0 %v334_v46 }
 0x109   :  { %561 = vmatprep.subr.mxu0 %v618_v5 }
 0x10a   :  { %562 = vmatpush3.msra.mxu0 %v333_v47 }
 0x10b   :  { %563 = vmatprep.subr.mxu0 %v618_v5 }
 0x10c   :  { %564 = vmatpush3.msra.mxu0 %v332_v48 }
 0x10d   :  { %565 = vmatprep.subr.mxu0 %v618_v5 }
 0x10e   :  { %566 = vmatpush3.msra.mxu0 %v331_v49 }
 0x10f   :  { %567 = vmatprep.subr.mxu0 %v618_v5 }
 0x110   :  { %568 = vmatpush3.msra.mxu0 %v330_v50 }
 0x111   :  { %569 = vmatprep.subr.mxu0 %v618_v5 }
 0x112   :  { %570 = vmatpush3.msra.mxu0 %v329_v51 }
 0x113   :  { %571 = vmatprep.subr.mxu0 %v618_v5 }
 0x114   :  { %572 = vmatpush3.msra.mxu0 %v328_v52 }
 0x115   :  { %573 = vmatprep.subr.mxu0 %v618_v5 }
 0x116   :  { %574 = vmatpush3.msra.mxu0 %v327_v53 }
 0x117   :  { %575 = vmatprep.subr.mxu0 %v618_v5 }
 0x118   :  { %576 = vmatpush3.msra.mxu0 %v326_v54 }
 0x119   :  { %577 = vmatprep.subr.mxu0 %v618_v5 }
 0x11a   :  { %578 = vmatpush3.msra.mxu0 %v325_v55 }
 0x11b   :  { %579 = vmatprep.subr.mxu0 %v618_v5 }
 0x11c   :  { %580 = vmatpush3.msra.mxu0 %v324_v56 }
 0x11d   :  { %581 = vmatprep.subr.mxu0 %v618_v5 }
 0x11e   :  { %582 = vmatpush3.msra.mxu0 %v323_v62 }
 0x11f   :  { %583 = vmatprep.subr.mxu0 %v618_v5 }
 0x120   :  { %584 = vmatpush3.msra.mxu0 %v322_v63 }
 0x121   :  { %585 = vmatprep.subr.mxu0 %v618_v5 }
 0x122   :  { %586 = vmatpush3.msra.mxu0 %v321_v0 }
 0x1c3   :  { %v222_v58 = vpop.f32.mrf.mxu0 }
 0x1c4   :  { %v223_v59 = vadd.f32 %v431_v57, %v222_v58 }
 0x1c5   :  { %v519_v60 = vpop.f32.mrf.mxu0 }
 0x1c6   :  { %v226_v61 = vmax.f32 %v223_v59, 0.0 }
 0x1c8   :  { %553 = vmatmul.mubr.f32.vlgmr.msra.gmra.mxu1 %v226_v61 }
 0x288   :  { %v316_v2 = vpop.f32.mrf.mxu1 }
 0x289   :  { %v317_v3 = vadd.f32 %v432_v1, %v316_v2 }
 0x28a   :  { %v554_v4 = vpop.f32.mrf.mxu1 }
 0x28b   :  { %v320_v6 = vmax.f32 %v317_v3, 0.0 }
 0x28d   :  { %588 = vmatmul.mubr.f32.vlgmr.msra.gmra.mxu0 %v320_v6 }
 0x34d   :  { %v410_v8 = vpop.f32.mrf.mxu0 }
 0x34e   :  { %v411_v5 = vadd.f32 %v433_v7, %v410_v8 }
 0x34f   :  { %v589_v9 = vpop.f32.mrf.mxu0 }
 0x350   :  { %414 = vst [vmem:[#allocation3] sm:$0xff] %v411_v5 }
 0x351   :  { %419 = vsyncadd [#allocation4], 64  ;;  %s622_s5 = smov [#allocation3]  }
 0x352   :  { %s420_s21 = sshll.u32 %s622_s5, 4  ;;  %s421_s21 = int_to_ptr.vmem [resolvable:$true] %s420_s21 }
 0x353   :  { %s596_s23 = scalar_lea.vmem %s421_s21, 64  ;;  %s600_s4 = scalar_lea.vmem %s421_s21, 128 }
 0x354   :  { %p597_p0 = scmp.ne.s32.totalorder %s421_s21, %s596_s23  ;;  %p601_p1 = scmp.lt.s32.totalorder %s421_s21, %s421_s21 }
 0x355   :  { %p602_p2 = scmp.lt.s32.totalorder %s600_s4, %s596_s23 }
 0x357   :  { %p603_p3 = por %p602_p2, %p601_p1 }
 0x359   :  { %p604_p4 = pnand %p603_p3, %p597_p0 }
 0x35b   :  { %607 = shalt.err (!%p604_p4)
}
 0x35c   :  { %s623_s24 = smov 4  }
 0x35d   :  { %426 = dma.vmem_to_hbm [thread:$0]  %s421_s21, 64, %s913_s7, [#allocation4], %s619_s22, %s619_s22, %s623_s24  }
 0x35e   :  { %616 = dma.done.wait [#allocation4], 128  }
 0x35f   :  { %617 = vsyncadd [#allocation4], 4294967168 }
 0x360   :  { %430 = vsyncpa [#allocation4], 1 }

</bundles_post_ra>
